<compile_context>
chip_gen: v7x
topology: tpu7x:2x2x1
jax: 0.10.0
libtpu: 0.0.40
codegen_flags: <defaults>
</compile_context>

<pallas_src>
import jax
import jax.numpy as jnp
from jax.experimental import pallas as pl
from jax.experimental.pallas import tpu as pltpu


def _critic_kernel(obs_ref, fw_ref, fb_ref, w0_ref, b0_ref, wh_ref, bh_ref, out_ref):
    """One batch tile of the Critic forward pass.

    obs_ref : (TILE_B, obs_dim)     f32 (or bf16 if the producer already emits bf16)
    fw_ref  : (obs_dim, feat_dim)   feature_net Linear weight   (resident, f32/bf16)
    fb_ref  : (1, feat_dim)         feature_net Linear bias     (resident, f32)
    w0_ref  : (feat_dim, hidden)    first value Linear weight   (resident, f32/bf16)
    b0_ref  : (1, hidden)           first value Linear bias     (resident, f32)
    wh_ref  : (1, hidden)           folded tail weight (row form, f32)
    bh_ref  : (1, 1)                folded tail bias (f32)
    out_ref : (1, TILE_B)           critic values, lane-dense
    """
    x = obs_ref[...]
    if x.dtype != fw_ref.dtype:
        # In-kernel VPU cast (free slack under the MXU); avoids a wrapper-side
        # f32->bf16 pass over obs in HBM.
        x = x.astype(fw_ref.dtype)

    # feature_net: Linear + ReLU.  MXU matmul with f32 accumulation; bias/ReLU in f32.
    h = jnp.dot(x, fw_ref[...], preferred_element_type=jnp.float32)
    h = jnp.maximum(h + fb_ref[...], 0.0)

    # value_net: first Linear + ReLU.
    if h.dtype != w0_ref.dtype:
        h = h.astype(w0_ref.dtype)
    h = jnp.dot(h, w0_ref[...], preferred_element_type=jnp.float32)
    h = jnp.maximum(h + b0_ref[...], 0.0)

    # Folded tail (middle Linears + 1-wide head) as an NT matmul: contract the hidden
    # axis of both (1,hidden) and (tile_b,hidden) -> (1, tile_b).  The result is
    # natively lane-dense, so the store below is a handful of full-lane vst instead of
    # tile_b/8 masked vst.msk of a sublane-major (tile_b,1) column.
    v = jax.lax.dot_general(wh_ref[...], h, (((1,), (1,)), ((), ())),
                            preferred_element_type=jnp.float32)
    out_ref[...] = (v + bh_ref[...]).astype(out_ref.dtype)


def prepare_critic_params(feat_w, feat_b, value_ws, value_bs, *, mxu_dtype=None):
    """One-time parameter prep (call once, NOT per minibatch).

    * Folds the activation-free tail of value_net (the (hidden_depth-1) middle Linears
      plus the final Linear(hidden, 1)) into a single (hidden -> 1) linear map:
        W_fold = W1 @ W2 @ ... @ Wk,   b_fold = ((b1 @ W2 + b2) @ W3 + ...) + bk
      which is mathematically identical (no activation between them).
    * Optionally pre-casts the two big MXU weights to `mxu_dtype` (e.g. jnp.bfloat16 —
      valid on v5e/v6e/v7x alike); obs itself is cast inside the kernel, and all bias /
      ReLU / head arithmetic stays f32.
    """
    w_fold = value_ws[1]
    b_fold = value_bs[1]
    for w, b in zip(value_ws[2:], value_bs[2:]):
        b_fold = b_fold @ w + b
        w_fold = w_fold @ w
    w_head = jnp.transpose(w_fold).astype(jnp.float32)   # (1, hidden)
    b_head = b_fold.reshape(1, 1).astype(jnp.float32)    # (1, 1)

    fw = feat_w if mxu_dtype is None else feat_w.astype(mxu_dtype)
    w0 = value_ws[0] if mxu_dtype is None else value_ws[0].astype(mxu_dtype)
    return (fw, feat_b, w0, value_bs[0], w_head, b_head)


def critic_forward(obs, params, *, tile_b=512):
    """Pallas Critic forward.

    obs    : (batch, obs_dim), f32 (or bf16 straight from the producer)
    params : output of prepare_critic_params
    tile_b : batch rows per grid step (rounded to a multiple of 128; raise for large
             PPO batches — VMEM cost is only ~tile_b * obs_dim * 4 B per buffer).
    """
    batch, obs_dim = obs.shape
    fw, fb, w0, b0, wh, bh = params
    feat_dim = fw.shape[1]
    hidden = w0.shape[1]

    # Lane-dense (1, tile_b) output blocks require tile_b % 128 == 0.
    tile_b = max(128, (int(tile_b) // 128) * 128)
    # v7x megacore: cap tile_b so the grid has >= 2 steps whenever batch allows, keeping
    # both TensorCores streaming tiles under dimension_semantics=("parallel",).
    half = -(-batch // 2)
    tile_b = min(tile_b, -(-half // 128) * 128)
    n_tiles = pl.cdiv(batch, tile_b)   # boundary block handled by Pallas masking

    flops = 2 * batch * (obs_dim * feat_dim + feat_dim * hidden + hidden)
    bytes_accessed = int(
        obs.size * obs.dtype.itemsize
        + sum(int(p.size) * p.dtype.itemsize for p in params)
        + batch * 4)
    cost = pl.CostEstimate(flops=flops, transcendentals=0,
                           bytes_accessed=bytes_accessed)

    out = pl.pallas_call(
        _critic_kernel,
        out_shape=jax.ShapeDtypeStruct((1, batch), jnp.float32),
        grid=(n_tiles,),
        in_specs=[pl.BlockSpec((tile_b, obs_dim), lambda i: (i, 0))]          # batch-tiled obs
                 + [pl.BlockSpec(p.shape, lambda i: (0, 0)) for p in params],  # VMEM-resident
        out_specs=pl.BlockSpec((1, tile_b), lambda i: (0, i)),                 # lane-dense
        compiler_params=pltpu.CompilerParams(
            dimension_semantics=("parallel",)),        # megacore split on v7x
        cost_estimate=cost,
    )(obs, *params)

    # (1, batch) -> (batch, 1) is a contiguous reshape (free), not a copy.
    return out.reshape(batch, 1)


def _reference_forward(obs, feat_w, feat_b, value_ws, value_bs):
    """Pure-JAX reference matching the PyTorch module exactly (no folding)."""
    h = jnp.maximum(obs @ feat_w + feat_b, 0.0)                   # feature_net
    h = jnp.maximum(h @ value_ws[0] + value_bs[0], 0.0)           # Linear + ReLU
    for w, b in zip(value_ws[1:], value_bs[1:]):                  # middle Linears + head
        h = h @ w + b
    return h


if __name__ == "__main__":
    # Small, deterministic configuration.  batch is deliberately NOT a multiple of the
    # tile so the cdiv grid + masked boundary block path is exercised (2 grid steps).
    batch = 300
    obs_dim = 24        # flat observation vector
    feat_dim = 32       # feature_net.output_dim
    hidden_dim = 32
    hidden_depth = 2    # -> value_net: Linear(32,32)+ReLU, Linear(32,32), Linear(32,1)

    key = jax.random.PRNGKey(0)
    keys = jax.random.split(key, 16)

    obs = jax.random.normal(keys[0], (batch, obs_dim), dtype=jnp.float32)

    # feature_net params (Linear stored as [in, out]).
    feat_w = jax.random.normal(keys[1], (obs_dim, feat_dim), dtype=jnp.float32) * 0.1
    feat_b = jax.random.normal(keys[2], (1, feat_dim), dtype=jnp.float32) * 0.1

    # value_net params: [feat->hidden], (hidden_depth-1) x [hidden->hidden], [hidden->1].
    layer_dims = [(feat_dim, hidden_dim)]
    layer_dims += [(hidden_dim, hidden_dim)] * (hidden_depth - 1)
    layer_dims += [(hidden_dim, 1)]

    value_ws, value_bs = [], []
    for i, (din, dout) in enumerate(layer_dims):
        value_ws.append(
            jax.random.normal(keys[3 + 2 * i], (din, dout), dtype=jnp.float32) * 0.1)
        value_bs.append(
            jax.random.normal(keys[4 + 2 * i], (1, dout), dtype=jnp.float32) * 0.1)

    ref = _reference_forward(obs, feat_w, feat_b, value_ws, value_bs)

    # f32 MXU path (matches the reference up to fp32 reassociation from the tail fold).
    params_f32 = prepare_critic_params(feat_w, feat_b, value_ws, value_bs)
    out = jax.block_until_ready(critic_forward(obs, params_f32, tile_b=512))
    assert out.shape == (batch, 1), out.shape
    assert jnp.allclose(out, ref, atol=1e-5, rtol=1e-5), (out, ref)

    # bf16 MXU-operand path (valid on v5e/v6e/v7x): weights pre-cast once, obs cast
    # in-kernel; accumulation and all elementwise math stay f32.
    params_bf16 = prepare_critic_params(feat_w, feat_b, value_ws, value_bs,
                                        mxu_dtype=jnp.bfloat16)
    out_bf16 = jax.block_until_ready(critic_forward(obs, params_bf16, tile_b=512))
    assert out_bf16.shape == (batch, 1), out_bf16.shape
    assert jnp.allclose(out_bf16, ref, atol=3e-2, rtol=3e-2), (out_bf16, ref)

    print("KERNEL_OK")
</pallas_src>

<mosaic_0001>
module attributes {stable_mosaic.version = 11 : i64} {
  func.func @_critic_kernel(%arg0: i32, %arg1: memref<256x24xf32, #tpu.memory_space<vmem>>, %arg2: memref<24x32xf32, #tpu.memory_space<vmem>>, %arg3: memref<1x32xf32, #tpu.memory_space<vmem>>, %arg4: memref<32x32xf32, #tpu.memory_space<vmem>>, %arg5: memref<1x32xf32, #tpu.memory_space<vmem>>, %arg6: memref<1x32xf32, #tpu.memory_space<vmem>>, %arg7: memref<1x1xf32, #tpu.memory_space<vmem>>, %arg8: memref<1x256xf32, #tpu.memory_space<vmem>>) attributes {dimension_semantics = [#tpu.dimension_semantics<parallel>], iteration_bounds = array<i64: 2>, scalar_prefetch = 0 : i64, scratch_operands = 0 : i64, tpu.core_type = #tpu.core_type<tc>, window_params = [{transform_indices = @transform_0, window_bounds = array<i64: 256, 24>}, {pipeline_mode = #tpu.pipeline_mode<synchronous>, transform_indices = @transform_1, window_bounds = array<i64: 24, 32>}, {pipeline_mode = #tpu.pipeline_mode<synchronous>, transform_indices = @transform_2, window_bounds = array<i64: 1, 32>}, {pipeline_mode = #tpu.pipeline_mode<synchronous>, transform_indices = @transform_3, window_bounds = array<i64: 32, 32>}, {pipeline_mode = #tpu.pipeline_mode<synchronous>, transform_indices = @transform_4, window_bounds = array<i64: 1, 32>}, {pipeline_mode = #tpu.pipeline_mode<synchronous>, transform_indices = @transform_5, window_bounds = array<i64: 1, 32>}, {pipeline_mode = #tpu.pipeline_mode<synchronous>, transform_indices = @transform_6, window_bounds = array<i64: 1, 1>}, {transform_indices = @transform_7, window_bounds = array<i64: 1, 256>}]} {
    %c0 = arith.constant 0 : index
    %c0_0 = arith.constant 0 : index
    %0 = vector.load %arg1[%c0, %c0_0] : memref<256x24xf32, #tpu.memory_space<vmem>>, vector<256x24xf32>
    %c0_1 = arith.constant 0 : index
    %c0_2 = arith.constant 0 : index
    %1 = vector.load %arg2[%c0_1, %c0_2] : memref<24x32xf32, #tpu.memory_space<vmem>>, vector<24x32xf32>
    %cst = arith.constant dense<0.000000e+00> : vector<256x32xf32>
    %2 = tpu.matmul %0, %1, %cst {dimension_numbers = #tpu.dot_dimension_numbers<[1], [0], [0], [1], [0, 0, 1, 1], [], []>} : vector<256x24xf32>, vector<24x32xf32>, vector<256x32xf32> -> vector<256x32xf32>
    %c0_3 = arith.constant 0 : index
    %c0_4 = arith.constant 0 : index
    %3 = vector.load %arg3[%c0_3, %c0_4] : memref<1x32xf32, #tpu.memory_space<vmem>>, vector<1x32xf32>
    %4 = vector.broadcast %3 : vector<1x32xf32> to vector<256x32xf32>
    %5 = arith.addf %2, %4 : vector<256x32xf32>
    %cst_5 = arith.constant 0.000000e+00 : f32
    %6 = vector.broadcast %cst_5 : f32 to vector<256x32xf32>
    %7 = arith.maximumf %5, %6 : vector<256x32xf32>
    %c0_6 = arith.constant 0 : index
    %c0_7 = arith.constant 0 : index
    %8 = vector.load %arg4[%c0_6, %c0_7] : memref<32x32xf32, #tpu.memory_space<vmem>>, vector<32x32xf32>
    %cst_8 = arith.constant dense<0.000000e+00> : vector<256x32xf32>
    %9 = tpu.matmul %7, %8, %cst_8 {dimension_numbers = #tpu.dot_dimension_numbers<[1], [0], [0], [1], [0, 0, 1, 1], [], []>} : vector<256x32xf32>, vector<32x32xf32>, vector<256x32xf32> -> vector<256x32xf32>
    %c0_9 = arith.constant 0 : index
    %c0_10 = arith.constant 0 : index
    %10 = vector.load %arg5[%c0_9, %c0_10] : memref<1x32xf32, #tpu.memory_space<vmem>>, vector<1x32xf32>
    %11 = vector.broadcast %10 : vector<1x32xf32> to vector<256x32xf32>
    %12 = arith.addf %9, %11 : vector<256x32xf32>
    %cst_11 = arith.constant 0.000000e+00 : f32
    %13 = vector.broadcast %cst_11 : f32 to vector<256x32xf32>
    %14 = arith.maximumf %12, %13 : vector<256x32xf32>
    %c0_12 = arith.constant 0 : index
    %c0_13 = arith.constant 0 : index
    %15 = vector.load %arg6[%c0_12, %c0_13] : memref<1x32xf32, #tpu.memory_space<vmem>>, vector<1x32xf32>
    %cst_14 = arith.constant dense<0.000000e+00> : vector<1x256xf32>
    %16 = tpu.matmul %15, %14, %cst_14 {dimension_numbers = #tpu.dot_dimension_numbers<[1], [1], [0], [0], [0, 0, 1, 0], [], []>} : vector<1x32xf32>, vector<256x32xf32>, vector<1x256xf32> -> vector<1x256xf32>
    %c0_15 = arith.constant 0 : index
    %c0_16 = arith.constant 0 : index
    %17 = vector.load %arg7[%c0_15, %c0_16] : memref<1x1xf32, #tpu.memory_space<vmem>>, vector<1x1xf32>
    %18 = vector.broadcast %17 : vector<1x1xf32> to vector<1x256xf32>
    %19 = arith.addf %16, %18 : vector<1x256xf32>
    %c0_17 = arith.constant 0 : index
    %c0_18 = arith.constant 0 : index
    %20 = vector.load %arg8[%c0_17, %c0_18] : memref<1x256xf32, #tpu.memory_space<vmem>>, vector<1x256xf32>
    tpu.vector_store %arg8[%c0_17, %c0_18], %19 {strides = array<i32>} : memref<1x256xf32, #tpu.memory_space<vmem>>, vector<1x256xf32>,
    return
  }
  func.func @transform_0(%arg0: i32) -> (i32, i32) {
    %c0_i32 = arith.constant 0 : i32
    %c0_i32_0 = arith.constant 0 : i32
    return %arg0, %c0_i32 : i32, i32
  }
  func.func @transform_1(%arg0: i32) -> (i32, i32) {
    %c0_i32 = arith.constant 0 : i32
    %c0_i32_0 = arith.constant 0 : i32
    %c0_i32_1 = arith.constant 0 : i32
    return %c0_i32, %c0_i32_0 : i32, i32
  }
  func.func @transform_2(%arg0: i32) -> (i32, i32) {
    %c0_i32 = arith.constant 0 : i32
    %c0_i32_0 = arith.constant 0 : i32
    %c0_i32_1 = arith.constant 0 : i32
    return %c0_i32, %c0_i32_0 : i32, i32
  }
  func.func @transform_3(%arg0: i32) -> (i32, i32) {
    %c0_i32 = arith.constant 0 : i32
    %c0_i32_0 = arith.constant 0 : i32
    %c0_i32_1 = arith.constant 0 : i32
    return %c0_i32, %c0_i32_0 : i32, i32
  }
  func.func @transform_4(%arg0: i32) -> (i32, i32) {
    %c0_i32 = arith.constant 0 : i32
    %c0_i32_0 = arith.constant 0 : i32
    %c0_i32_1 = arith.constant 0 : i32
    return %c0_i32, %c0_i32_0 : i32, i32
  }
  func.func @transform_5(%arg0: i32) -> (i32, i32) {
    %c0_i32 = arith.constant 0 : i32
    %c0_i32_0 = arith.constant 0 : i32
    %c0_i32_1 = arith.constant 0 : i32
    return %c0_i32, %c0_i32_0 : i32, i32
  }
  func.func @transform_6(%arg0: i32) -> (i32, i32) {
    %c0_i32 = arith.constant 0 : i32
    %c0_i32_0 = arith.constant 0 : i32
    %c0_i32_1 = arith.constant 0 : i32
    return %c0_i32, %c0_i32_0 : i32, i32
  }
  func.func @transform_7(%arg0: i32) -> (i32, i32) {
    %c0_i32 = arith.constant 0 : i32
    %c0_i32_0 = arith.constant 0 : i32
    return %c0_i32, %arg0 : i32, i32
  }
}

</mosaic_0001>

<bundles_post_ra>
// kernel: tpu_custom_call.1
= control target key start
LH: loop header
LB: loop body
LE: loop exit
PB: predicated region body
PF: predicated region fallthrough
CT: control target
= control target key end

     0   :  { %s2265_s0 = inlined_call_operand.vmem [shape: f32[300,24], index: 0, kind: input, shape index: {}]   ;;  %s2266_s1 = inlined_call_operand.vmem [shape: f32[24,32], index: 1, kind: input, shape index: {}]   ;;  %s2267_s2 = inlined_call_operand.vmem [shape: f32[1,32], index: 2, kind: input, shape index: {}]   ;;  %s2268_s3 = inlined_call_operand.vmem [shape: f32[32,32], index: 3, kind: input, shape index: {}]   ;;  %s2269_s4 = inlined_call_operand.vmem [shape: f32[1,32], index: 4, kind: input, shape index: {}]   ;;  %s2270_s5 = inlined_call_operand.vmem [shape: f32[1,32], index: 5, kind: input, shape index: {}]   ;;  %s2271_s6 = inlined_call_operand.<no memory space> [shape: f32[1,1], index: 6, kind: input, shape index: {}]   ;;  %s2272_s7 = inlined_call_operand.hbm [shape: f32[1,300], index: 7, kind: output, shape index: {}]  }
   0x1   :  { %v12_v0 = vstv %s2271_s6 }
   0x2   :  { %13 = vst [vmem:[#allocation2] sm:$0x1] %v12_v0 }
   0x3   :  { %14 = vsyncpa [#allocation4], 0 }
   0x4   :  { %16 = vsyncpa [#allocation4 + $0x1], 0  ;;  %s1890_s26 = smov 0   ;;  %s1892_s27 = smov 0  }
   0x5   :  { %s1894_s28 = smov 0   ;;  %s1896_s29 = smov 0  }
   0x6 LB: > { %s1911_s6 = sadd.s32 4294967295, %s1842_s29   ;;  %s1350_s30 = sadd.s32 4294967294, %s1842_s29   ;;  %s1842_s29 = sphi %s1896_s29, %s2280_s29   ;;  %s1838_s28 = sphi %s1894_s28, %s2279_s28   ;;  %s1834_s27 = sphi %s1892_s27, %s2278_s27   ;;  %s1830_s26 = sphi %s1890_s26, %s2277_s26  }
   0x7   : > { %s1915_s8 = sadd.s32 1, %s1842_s29   ;;  %s181_s9 = sadd.s32 1, %s1838_s28 }
   0x8   : > { %s178_s10 = ssub.s32 %s1842_s29, %s1915_s8  ;;  %p191_p0 = scmp.ne.s32.totalorder %s1838_s28, %s1834_s27 }
   0x9   : > { %p179_p1 = scmp.eq.s32.totalorder %s178_s10, 0  ;;  %p192_p2 = scmp.eq.s32.totalorder %s1911_s6, 1 }
   0xa   : > { %p197_p3 = scmp.ne.s32.totalorder %s1834_s27, %s1830_s26  ;;  %p198_p4 = scmp.eq.s32.totalorder %s1350_s30, 1 }
   0xb   : > { %s1926_s11 = scalar_select %p179_p1, %s1838_s28, %s181_s9  }
   0xc   : > { %p1928_p5 = por %p192_p2, %p191_p0  ;;  %p1932_p6 = por %p198_p4, %p197_p3 }
   0xd   : > { %p1353_p7 = scmp.ge.s32.totalorder %s1842_s29, 1  ;;  %p251_p8 = scmp.lt.s32.totalorder %s1842_s29, 3 }
   0xf   : > { %p252_p9 = pnand %p1353_p7, %p251_p8 }
  0x10   : > { %v338_v1 = vld [vmem:[%s2266_s1] sm:$0xff] (!%p252_p9)  ;;  %v339_v2 = vld [vmem:[%s2266_s1 + $0x8] sm:$0xff] (!%p252_p9)  ;;  %s1945_s18 = sshll.u32 (!%p252_p9), %s1911_s6, 5  ;;  %v340_v6 = vld [vmem:[%s2266_s1 + $0x10] sm:$0xff] (!%p252_p9)  ;;  %vm348_vm0 = vcmask (!%p252_p9), 195584   ;;  %vm713_vm1 = vcmask (!%p252_p9), 261120  }
  0x11   : > { %255 = sbr.rel (%p252_p9) target bundleno = 812 (0x32c), region = 48  ;;  %v1679_v3 = vpack.c.bf16 (!%p252_p9), %v339_v2, %v338_v1  ;;  %p292_p10 = scmp.lt.s32.totalorder (!%p252_p9), %s1945_s18, 37  ;;  %v702_v4 = vld [vmem:[%s2268_s3] sm:$0xff] (!%p252_p9)  ;;  %v703_v5 = vld [vmem:[%s2268_s3 + $0x8] sm:$0xff] (!%p252_p9)  ;;  %v704_v40 = vld [vmem:[%s2268_s3 + $0x10] sm:$0xff] (!%p252_p9) }
  0x12   : > { %v1683_v7 = vpack.c.bf16 (!%p252_p9), %v703_v5, %v702_v4  ;;  %v705_v41 = vld [vmem:[%s2268_s3 + $0x18] sm:$0xff] (!%p252_p9)  ;;  %v2036_v43 = vld [vmem:[%s2267_s2] ss:$0 sm:$0xff] (!%p252_p9)  ;;  %vm2151_vm2 = vmpackc.low (!%p252_p9), %vm713_vm1, %vm713_vm1 }
  0x13   : > { %1680 = vmatprep.subr.bf16.mxu0 (!%p252_p9), %v1679_v3  ;;  %v1687_v42 = vpack.c.bf16 (!%p252_p9), %v705_v41, %v704_v40 }
  0x14   : > { %1682 = vmatpush3.bf16.msra.mxu0 (!%p252_p9), %v1679_v3  ;;  %1684 = vmatprep.subr.bf16.mxu1 (!%p252_p9), %v1683_v7 }
  0x15   : > { %1573 = vmatprep.subr.mxu0 (!%p252_p9), %v340_v6  ;;  %1686 = vmatpush3.bf16.msra.mxu1 (!%p252_p9), %v1683_v7 }
  0x16   : > { %1688 = vmatprep.subr.bf16.mxu1 (!%p252_p9), %v1687_v42 }
  0x18   : > { %s293_s25 = scalar_select %p292_p10, %s1945_s18, 37  ;;  %1574 = vmatpush3.msra.mxu0 %v340_v6 }
  0x19   : > { %1690 = vmatpush3.bf16.msra.mxu1 %v1687_v42  ;;  %s1457_s15 = sshll.u32 (%p1928_p5), %s1911_s6, 1 }
  0x1a   : > { %s1356_s30 = sshll.u32 %s293_s25, 3  ;;  %s1280_s16 = ssub.s32 (%p1928_p5), 3, %s1457_s15 }
  0x1b   : > { %s1961_s14 = scalar_lea.vmem %s2265_s0, %s1356_s30  ;;  %s284_s30 = sand.u32 1, %s1834_s27  }
  0x1c   : > { %v306_v8 = vld [vmem:[%s1961_s14] sm:$0xff]  ;;  %v307_v9 = vld [vmem:[%s1961_s14 + $0x8] sm:$0xff]  ;;  %v308_v10 = vld [vmem:[%s1961_s14 + $0x10] sm:$0xff]  ;;  %s1354_s9 = sshll.u32 %s284_s30, 1  ;;  %p1281_p11 = scmp.lt.s32.totalorder (%p1928_p5), %s1280_s16, 2 }
  0x1d   : > { %1575 = vmatprep.mubr.msk.f32.mxu0 %vm348_vm0, %v306_v8  ;;  %v309_v11 = vld [vmem:[%s1961_s14 + $0x18] sm:$0xff]  ;;  %v310_v12 = vld [vmem:[%s1961_s14 + $0x20] sm:$0xff]  ;;  %v311_v13 = vld [vmem:[%s1961_s14 + $0x28] sm:$0xff]  ;;  %s286_s10 = scalar_lea.vmem [#allocation3], %s1354_s9 }
  0x1e   : > { %1576 = vmatmul.mubr.msk.f32.vlgmr.msra.gmra.mrb[0].mxu0 %vm348_vm0, %v307_v9  ;;  %v312_v14 = vld [vmem:[%s1961_s14 + $0x30] sm:$0xff]  ;;  %v313_v15 = vld [vmem:[%s1961_s14 + $0x38] sm:$0xff]  ;;  %v314_v16 = vld [vmem:[%s1961_s14 + $0x40] sm:$0xff] }
  0x1f   : > { %1578 = vmatprep.mubr.msk.f32.mxu0 %vm348_vm0, %v308_v10  ;;  %v315_v17 = vld [vmem:[%s1961_s14 + $0x48] sm:$0xff]  ;;  %v316_v18 = vld [vmem:[%s1961_s14 + $0x50] sm:$0xff]  ;;  %v317_v19 = vld [vmem:[%s1961_s14 + $0x58] sm:$0xff] }
  0x20   : > { %v318_v20 = vld [vmem:[%s1961_s14 + $0x60] sm:$0xff]  ;;  %v319_v21 = vld [vmem:[%s1961_s14 + $0x68] sm:$0xff]  ;;  %v320_v22 = vld [vmem:[%s1961_s14 + $0x70] sm:$0xff] }
  0x21   : > { %v321_v23 = vld [vmem:[%s1961_s14 + $0x78] sm:$0xff]  ;;  %v322_v24 = vld [vmem:[%s1961_s14 + $0x80] sm:$0xff]  ;;  %v323_v25 = vld [vmem:[%s1961_s14 + $0x88] sm:$0xff] }
  0x22   : > { %1579 = vmatmul.mubr.msk.f32.gmra.mrb[2].mxu0 %vm348_vm0, %v309_v11  ;;  %v324_v26 = vld [vmem:[%s1961_s14 + $0x90] sm:$0xff]  ;;  %v325_v27 = vld [vmem:[%s1961_s14 + $0x98] sm:$0xff]  ;;  %v326_v28 = vld [vmem:[%s1961_s14 + $0xa0] sm:$0xff] }
  0x23   : > { %1581 = vmatprep.mubr.msk.f32.mxu0 %vm348_vm0, %v310_v12  ;;  %v327_v29 = vld [vmem:[%s1961_s14 + $0xa8] sm:$0xff]  ;;  %v328_v30 = vld [vmem:[%s1961_s14 + $0xb0] sm:$0xff]  ;;  %v329_v31 = vld [vmem:[%s1961_s14 + $0xb8] sm:$0xff] }
  0x24   : > { %v330_v32 = vld [vmem:[%s1961_s14 + $0xc0] sm:$0xff]  ;;  %v331_v33 = vld [vmem:[%s1961_s14 + $0xc8] sm:$0xff]  ;;  %v332_v34 = vld [vmem:[%s1961_s14 + $0xd0] sm:$0xff] }
  0x25   : > { %v333_v35 = vld [vmem:[%s1961_s14 + $0xd8] sm:$0xff]  ;;  %v334_v36 = vld [vmem:[%s1961_s14 + $0xe0] sm:$0xff]  ;;  %v335_v37 = vld [vmem:[%s1961_s14 + $0xe8] sm:$0xff] }
  0x26   : > { %1582 = vmatmul.mubr.msk.f32.gmra.mrb[4].mxu0 %vm348_vm0, %v311_v13  ;;  %v336_v38 = vld [vmem:[%s1961_s14 + $0xf0] sm:$0xff]  ;;  %v337_v39 = vld [vmem:[%s1961_s14 + $0xf8] sm:$0xff]  ;;  %s2211_s14 = scalar_lea.sflag [#allocation4], %s284_s30 }
  0x27   : > { %1584 = vmatprep.mubr.msk.f32.mxu0 %vm348_vm0, %v312_v14 }
  0x2a   : > { %1585 = vmatmul.mubr.msk.f32.gmra.mrb[6].mxu0 %vm348_vm0, %v313_v15 }
  0x2b   : > { %1587 = vmatprep.mubr.msk.f32.mxu0 %vm348_vm0, %v314_v16 }
  0x2e   : > { %1588 = vmatmul.mubr.msk.f32.gmra.mrb[8].mxu0 %vm348_vm0, %v315_v17 }
  0x2f   : > { %1590 = vmatprep.mubr.msk.f32.mxu0 %vm348_vm0, %v316_v18 }
  0x32   : > { %1591 = vmatmul.mubr.msk.f32.gmra.mrb[10].mxu0 %vm348_vm0, %v317_v19 }
  0x33   : > { %1593 = vmatprep.mubr.msk.f32.mxu0 %vm348_vm0, %v318_v20 }
  0x36   : > { %1594 = vmatmul.mubr.msk.f32.gmra.mrb[12].mxu0 %vm348_vm0, %v319_v21 }
  0x37   : > { %1596 = vmatprep.mubr.msk.f32.mxu0 %vm348_vm0, %v320_v22 }
  0x3a   : > { %1597 = vmatmul.mubr.msk.f32.gmra.mrb[14].mxu0 %vm348_vm0, %v321_v23 }
  0x3b   : > { %1599 = vmatprep.mubr.msk.f32.mxu0 %vm348_vm0, %v322_v24 }
  0x3e   : > { %1600 = vmatmul.mubr.msk.f32.gmra.mrb[16].mxu0 %vm348_vm0, %v323_v25 }
  0x3f   : > { %1602 = vmatprep.mubr.msk.f32.mxu0 %vm348_vm0, %v324_v26 }
  0x42   : > { %1603 = vmatmul.mubr.msk.f32.gmra.mrb[18].mxu0 %vm348_vm0, %v325_v27 }
  0x43   : > { %1605 = vmatprep.mubr.msk.f32.mxu0 %vm348_vm0, %v326_v28 }
  0x46   : > { %1606 = vmatmul.mubr.msk.f32.gmra.mrb[20].mxu0 %vm348_vm0, %v327_v29 }
  0x47   : > { %1608 = vmatprep.mubr.msk.f32.mxu0 %vm348_vm0, %v328_v30 }
  0x4a   : > { %1609 = vmatmul.mubr.msk.f32.gmra.mrb[22].mxu0 %vm348_vm0, %v329_v31 }
  0x4b   : > { %1611 = vmatprep.mubr.msk.f32.mxu0 %vm348_vm0, %v330_v32 }
  0x4e   : > { %1612 = vmatmul.mubr.msk.f32.gmra.mrb[24].mxu0 %vm348_vm0, %v331_v33 }
  0x4f   : > { %1614 = vmatprep.mubr.msk.f32.mxu0 %vm348_vm0, %v332_v34 }
  0x52   : > { %1615 = vmatmul.mubr.msk.f32.gmra.mrb[26].mxu0 %vm348_vm0, %v333_v35 }
  0x53   : > { %1617 = vmatprep.mubr.msk.f32.mxu0 %vm348_vm0, %v334_v36 }
  0x56   : > { %1618 = vmatmul.mubr.msk.f32.gmra.mrb[28].mxu0 %vm348_vm0, %v335_v37 }
  0x57   : > { %1620 = vmatprep.mubr.msk.f32.mxu0 %vm348_vm0, %v336_v38 }
  0x5a   : > { %1621 = vmatmul.mubr.msk.f32.gmra.mrb[30].mxu0 %vm348_vm0, %v337_v39 }
  0xf1   : > { %v1577_v44 = vpop.f32.mrb[0].mxu0 }
  0xf2   : > { %v517_v45 = vadd.f32 %v1577_v44, %v2036_v43  ;;  %v511_v46 = vpop.f32.mrb[1].mxu0 }
  0xf3   : > { %v512_v47 = vadd.f32 %v2036_v43, %v511_v46 }
  0xf4   : > { %v671_v50 = vmax.f32 %v517_v45, 0.0 }
  0xf5   : > { %v670_v48 = vmax.f32 %v512_v47, 0.0  ;;  %v1580_v49 = vpop.f32.mrb[2].mxu0 }
  0xf6   : > { %v527_v51 = vadd.f32 %v1580_v49, %v2036_v43  ;;  %v521_v52 = vpop.f32.mrb[3].mxu0 }
  0xf7   : > { %v522_v53 = vadd.f32 %v2036_v43, %v521_v52  ;;  %1631 = vmatprep.mubr.msk.f32.mxu1 %vm713_vm1, %v670_v48 }
  0xf8   : > { %1632 = vmatmul.mubr.msk.f32.vlgmr.msra.gmra.mrb[0].mxu1 %vm713_vm1, %v671_v50  ;;  %v673_v56 = vmax.f32 %v527_v51, 0.0 }
  0xf9   : > { %v672_v54 = vmax.f32 %v522_v53, 0.0  ;;  %v1583_v55 = vpop.f32.mrb[4].mxu0 }
  0xfa   : > { %v537_v57 = vadd.f32 %v1583_v55, %v2036_v43  ;;  %v531_v58 = vpop.f32.mrb[5].mxu0 }
  0xfb   : > { %v532_v59 = vadd.f32 %v2036_v43, %v531_v58  ;;  %1634 = vmatprep.mubr.msk.f32.mxu1 %vm713_vm1, %v672_v54 }
  0xfc   : > { %1635 = vmatmul.mubr.msk.f32.gmra.mrb[2].mxu1 %vm713_vm1, %v673_v56  ;;  %v675_v62 = vmax.f32 %v537_v57, 0.0 }
  0xfd   : > { %v674_v60 = vmax.f32 %v532_v59, 0.0  ;;  %v1586_v61 = vpop.f32.mrb[6].mxu0 }
  0xfe   : > { %v547_v63 = vadd.f32 %v1586_v61, %v2036_v43  ;;  %v541_v0 = vpop.f32.mrb[7].mxu0 }
  0xff   : > { %v542_v1 = vadd.f32 %v2036_v43, %v541_v0  ;;  %1637 = vmatprep.mubr.msk.f32.mxu1 %vm713_vm1, %v674_v60 }
 0x100   : > { %1638 = vmatmul.mubr.msk.f32.gmra.mrb[4].mxu1 %vm713_vm1, %v675_v62  ;;  %v677_v4 = vmax.f32 %v547_v63, 0.0 }
 0x101   : > { %v676_v2 = vmax.f32 %v542_v1, 0.0  ;;  %v1589_v3 = vpop.f32.mrb[8].mxu0 }
 0x102   : > { %v557_v5 = vadd.f32 %v1589_v3, %v2036_v43  ;;  %v551_v6 = vpop.f32.mrb[9].mxu0 }
 0x103   : > { %v552_v7 = vadd.f32 %v2036_v43, %v551_v6  ;;  %1640 = vmatprep.mubr.msk.f32.mxu1 %vm713_vm1, %v676_v2 }
 0x104   : > { %1641 = vmatmul.mubr.msk.f32.gmra.mrb[6].mxu1 %vm713_vm1, %v677_v4  ;;  %v679_v10 = vmax.f32 %v557_v5, 0.0 }
 0x105   : > { %v678_v8 = vmax.f32 %v552_v7, 0.0  ;;  %v1592_v9 = vpop.f32.mrb[10].mxu0 }
 0x106   : > { %v567_v11 = vadd.f32 %v1592_v9, %v2036_v43  ;;  %v561_v12 = vpop.f32.mrb[11].mxu0 }
 0x107   : > { %v562_v13 = vadd.f32 %v2036_v43, %v561_v12  ;;  %1643 = vmatprep.mubr.msk.f32.mxu1 %vm713_vm1, %v678_v8 }
 0x108   : > { %1644 = vmatmul.mubr.msk.f32.gmra.mrb[8].mxu1 %vm713_vm1, %v679_v10  ;;  %v681_v16 = vmax.f32 %v567_v11, 0.0 }
 0x109   : > { %v680_v14 = vmax.f32 %v562_v13, 0.0  ;;  %v1595_v15 = vpop.f32.mrb[12].mxu0  ;;  %v2105_v13 = vld [vmem:[%s2270_s5] sm:$0x1] }
 0x10a   : > { %v577_v17 = vadd.f32 %v1595_v15, %v2036_v43  ;;  %v571_v18 = vpop.f32.mrb[13].mxu0  ;;  %1567 = vmatprep.mubr.msk.f32.mxu0 %vm713_vm1, %v2105_v13  ;;  %v1844_v15 = vmov 0  }
 0x10b   : > { %v572_v19 = vadd.f32 %v2036_v43, %v571_v18  ;;  %1646 = vmatprep.mubr.msk.f32.mxu1 %vm713_vm1, %v680_v14  ;;  %v1068_v14 = vld [vmem:[#allocation2] sm:$0x1]  ;;  %1779 = vset.pattern.permute.xlu0 %v1844_v15 }
 0x10c   : > { %1647 = vmatmul.mubr.msk.f32.gmra.mrb[10].mxu1 %vm713_vm1, %v681_v16  ;;  %v683_v22 = vmax.f32 %v577_v17, 0.0  ;;  %1071 = vperm.xlu0 %1779, %v1068_v14  }
 0x10d   : > { %v682_v20 = vmax.f32 %v572_v19, 0.0  ;;  %v1598_v21 = vpop.f32.mrb[14].mxu0 }
 0x10e   : > { %v587_v23 = vadd.f32 %v1598_v21, %v2036_v43  ;;  %v581_v24 = vpop.f32.mrb[15].mxu0 }
 0x10f   : > { %v582_v25 = vadd.f32 %v2036_v43, %v581_v24  ;;  %1649 = vmatprep.mubr.msk.f32.mxu1 %vm713_vm1, %v682_v20 }
 0x110   : > { %1650 = vmatmul.mubr.msk.f32.gmra.mrb[12].mxu1 %vm713_vm1, %v683_v22  ;;  %v685_v28 = vmax.f32 %v587_v23, 0.0 }
 0x111   : > { %v684_v26 = vmax.f32 %v582_v25, 0.0  ;;  %v1601_v27 = vpop.f32.mrb[16].mxu0 }
 0x112   : > { %v597_v29 = vadd.f32 %v1601_v27, %v2036_v43  ;;  %v591_v30 = vpop.f32.mrb[17].mxu0 }
 0x113   : > { %v592_v31 = vadd.f32 %v2036_v43, %v591_v30  ;;  %1652 = vmatprep.mubr.msk.f32.mxu1 %vm713_vm1, %v684_v26 }
 0x114   : > { %1653 = vmatmul.mubr.msk.f32.gmra.mrb[14].mxu1 %vm713_vm1, %v685_v28  ;;  %v687_v34 = vmax.f32 %v597_v29, 0.0 }
 0x115   : > { %v686_v32 = vmax.f32 %v592_v31, 0.0  ;;  %v1604_v33 = vpop.f32.mrb[18].mxu0 }
 0x116   : > { %v607_v35 = vadd.f32 %v1604_v33, %v2036_v43  ;;  %v601_v36 = vpop.f32.mrb[19].mxu0 }
 0x117   : > { %v602_v37 = vadd.f32 %v2036_v43, %v601_v36  ;;  %1655 = vmatprep.mubr.msk.f32.mxu1 %vm713_vm1, %v686_v32 }
 0x118   : > { %v689_v38 = vmax.f32 %v607_v35, 0.0  ;;  %1656 = vmatmul.mubr.msk.f32.gmra.mrb[16].mxu1 %vm713_vm1, %v687_v34 }
 0x119   : > { %v688_v39 = vmax.f32 %v602_v37, 0.0  ;;  %v1607_v40 = vpop.f32.mrb[20].mxu0 }
 0x11a   : > { %v617_v41 = vadd.f32 %v1607_v40, %v2036_v43  ;;  %v611_v42 = vpop.f32.mrb[21].mxu0 }
 0x11b   : > { %1658 = vmatprep.mubr.msk.f32.mxu1 %vm713_vm1, %v688_v39  ;;  %v612_v44 = vadd.f32 %v2036_v43, %v611_v42 }
 0x11c   : > { %1659 = vmatmul.mubr.msk.f32.gmra.mrb[18].mxu1 %vm713_vm1, %v689_v38  ;;  %v691_v45 = vmax.f32 %v617_v41, 0.0 }
 0x11d   : > { %v690_v46 = vmax.f32 %v612_v44, 0.0  ;;  %v1610_v47 = vpop.f32.mrb[22].mxu0 }
 0x11e   : > { %v627_v48 = vadd.f32 %v1610_v47, %v2036_v43  ;;  %v621_v49 = vpop.f32.mrb[23].mxu0 }
 0x11f   : > { %1661 = vmatprep.mubr.msk.f32.mxu1 %vm713_vm1, %v690_v46  ;;  %v622_v50 = vadd.f32 %v2036_v43, %v621_v49 }
 0x120   : > { %1662 = vmatmul.mubr.msk.f32.gmra.mrb[20].mxu1 %vm713_vm1, %v691_v45  ;;  %v693_v51 = vmax.f32 %v627_v48, 0.0 }
 0x121   : > { %v692_v52 = vmax.f32 %v622_v50, 0.0  ;;  %v1613_v53 = vpop.f32.mrb[24].mxu0 }
 0x122   : > { %v637_v54 = vadd.f32 %v1613_v53, %v2036_v43  ;;  %v631_v55 = vpop.f32.mrb[25].mxu0 }
 0x123   : > { %1664 = vmatprep.mubr.msk.f32.mxu1 %vm713_vm1, %v692_v52  ;;  %v632_v56 = vadd.f32 %v2036_v43, %v631_v55 }
 0x124   : > { %1665 = vmatmul.mubr.msk.f32.gmra.mrb[22].mxu1 %vm713_vm1, %v693_v51  ;;  %v695_v57 = vmax.f32 %v637_v54, 0.0 }
 0x125   : > { %v694_v58 = vmax.f32 %v632_v56, 0.0  ;;  %v1616_v59 = vpop.f32.mrb[26].mxu0 }
 0x126   : > { %v647_v60 = vadd.f32 %v1616_v59, %v2036_v43  ;;  %v641_v61 = vpop.f32.mrb[27].mxu0 }
 0x127   : > { %1667 = vmatprep.mubr.msk.f32.mxu1 %vm713_vm1, %v694_v58  ;;  %v642_v62 = vadd.f32 %v2036_v43, %v641_v61 }
 0x128   : > { %1668 = vmatmul.mubr.msk.f32.gmra.mrb[24].mxu1 %vm713_vm1, %v695_v57  ;;  %v697_v63 = vmax.f32 %v647_v60, 0.0 }
 0x129   : > { %v696_v0 = vmax.f32 %v642_v62, 0.0  ;;  %v1619_v1 = vpop.f32.mrb[28].mxu0 }
 0x12a   : > { %v657_v2 = vadd.f32 %v1619_v1, %v2036_v43  ;;  %v651_v3 = vpop.f32.mrb[29].mxu0 }
 0x12b   : > { %1670 = vmatprep.mubr.msk.f32.mxu1 %vm713_vm1, %v696_v0  ;;  %v652_v4 = vadd.f32 %v2036_v43, %v651_v3 }
 0x12c   : > { %1671 = vmatmul.mubr.msk.f32.gmra.mrb[26].mxu1 %vm713_vm1, %v697_v63  ;;  %v699_v5 = vmax.f32 %v657_v2, 0.0 }
 0x12d   : > { %v698_v6 = vmax.f32 %v652_v4, 0.0  ;;  %v1622_v7 = vpop.f32.mrb[30].mxu0 }
 0x12e   : > { %v667_v8 = vadd.f32 %v1622_v7, %v2036_v43  ;;  %v661_v9 = vpop.f32.mrb[31].mxu0 }
 0x12f   : > { %1673 = vmatprep.mubr.msk.f32.mxu1 %vm713_vm1, %v698_v6  ;;  %v662_v10 = vadd.f32 %v2036_v43, %v661_v9  ;;  %v2112_v43 = vld [vmem:[%s2269_s4] ss:$0 sm:$0xff] }
 0x130   : > { %1674 = vmatmul.mubr.msk.f32.gmra.mrb[28].mxu1 %vm713_vm1, %v699_v5  ;;  %v701_v11 = vmax.f32 %v667_v8, 0.0 }
 0x131   : > { %v700_v12 = vmax.f32 %v662_v10, 0.0 }
 0x133   : > { %1676 = vmatprep.mubr.msk.f32.mxu1 %vm713_vm1, %v700_v12 }
 0x134   : > { %1677 = vmatmul.mubr.msk.f32.gmra.mrb[30].mxu1 %vm713_vm1, %v701_v11 }
 0x1cb   : > { %v1633_v16 = vpop.f32.mrb[0].mxu1 }
 0x1cc   : > { %v882_v17 = vadd.f32 %v1633_v16, %v2112_v43  ;;  %v876_v18 = vpop.f32.mrb[1].mxu1 }
 0x1cd   : > { %v877_v19 = vadd.f32 %v2112_v43, %v876_v18 }
 0x1ce   : > { %v1036_v20 = vmax.f32 %v882_v17, 0.0 }
 0x1cf   : > { %v1035_v21 = vmax.f32 %v877_v19, 0.0  ;;  %v1636_v22 = vpop.f32.mrb[2].mxu1 }
 0x1d0   : > { %v892_v23 = vadd.f32 %v1636_v22, %v2112_v43  ;;  %v886_v24 = vpop.f32.mrb[3].mxu1 }
 0x1d1   : > { %v2117_v25 = vpack.c.bf16 %v1036_v20, %v1035_v21  ;;  %v887_v26 = vadd.f32 %v2112_v43, %v886_v24 }
 0x1d2   : > { %v1038_v27 = vmax.f32 %v892_v23, 0.0 }
 0x1d3   : > { %v1037_v28 = vmax.f32 %v887_v26, 0.0  ;;  %v1639_v29 = vpop.f32.mrb[4].mxu1 }
 0x1d4   : > { %v902_v30 = vadd.f32 %v1639_v29, %v2112_v43  ;;  %v896_v31 = vpop.f32.mrb[5].mxu1 }
 0x1d5   : > { %v2121_v32 = vpack.c.bf16 %v1038_v27, %v1037_v28  ;;  %v897_v33 = vadd.f32 %v2112_v43, %v896_v31 }
 0x1d6   : > { %v1040_v34 = vmax.f32 %v902_v30, 0.0 }
 0x1d7   : > { %v1039_v35 = vmax.f32 %v897_v33, 0.0  ;;  %v1642_v36 = vpop.f32.mrb[6].mxu1 }
 0x1d8   : > { %v912_v37 = vadd.f32 %v1642_v36, %v2112_v43  ;;  %v906_v38 = vpop.f32.mrb[7].mxu1 }
 0x1d9   : > { %v2125_v39 = vpack.c.bf16 %v1040_v34, %v1039_v35  ;;  %v907_v40 = vadd.f32 %v2112_v43, %v906_v38 }
 0x1da   : > { %v1042_v41 = vmax.f32 %v912_v37, 0.0 }
 0x1db   : > { %v1041_v42 = vmax.f32 %v907_v40, 0.0  ;;  %v1645_v44 = vpop.f32.mrb[8].mxu1 }
 0x1dc   : > { %v922_v45 = vadd.f32 %v1645_v44, %v2112_v43  ;;  %v916_v46 = vpop.f32.mrb[9].mxu1 }
 0x1dd   : > { %v2129_v47 = vpack.c.bf16 %v1042_v41, %v1041_v42  ;;  %v917_v48 = vadd.f32 %v2112_v43, %v916_v46 }
 0x1de   : > { %v1044_v49 = vmax.f32 %v922_v45, 0.0 }
 0x1df   : > { %v1043_v50 = vmax.f32 %v917_v48, 0.0  ;;  %v1648_v51 = vpop.f32.mrb[10].mxu1 }
 0x1e0   : > { %v932_v52 = vadd.f32 %v1648_v51, %v2112_v43  ;;  %v926_v53 = vpop.f32.mrb[11].mxu1 }
 0x1e1   : > { %v2133_v54 = vpack.c.bf16 %v1044_v49, %v1043_v50  ;;  %v927_v55 = vadd.f32 %v2112_v43, %v926_v53 }
 0x1e2   : > { %v1046_v56 = vmax.f32 %v932_v52, 0.0 }
 0x1e3   : > { %v1045_v57 = vmax.f32 %v927_v55, 0.0  ;;  %v1651_v58 = vpop.f32.mrb[12].mxu1 }
 0x1e4   : > { %v942_v59 = vadd.f32 %v1651_v58, %v2112_v43  ;;  %v936_v60 = vpop.f32.mrb[13].mxu1 }
 0x1e5   : > { %v2137_v61 = vpack.c.bf16 %v1046_v56, %v1045_v57  ;;  %v937_v62 = vadd.f32 %v2112_v43, %v936_v60 }
 0x1e6   : > { %v1048_v63 = vmax.f32 %v942_v59, 0.0 }
 0x1e7   : > { %v1047_v0 = vmax.f32 %v937_v62, 0.0  ;;  %v1654_v1 = vpop.f32.mrb[14].mxu1 }
 0x1e8   : > { %v952_v2 = vadd.f32 %v1654_v1, %v2112_v43  ;;  %v946_v3 = vpop.f32.mrb[15].mxu1 }
 0x1e9   : > { %v2141_v4 = vpack.c.bf16 %v1048_v63, %v1047_v0  ;;  %v947_v5 = vadd.f32 %v2112_v43, %v946_v3 }
 0x1ea   : > { %v1050_v6 = vmax.f32 %v952_v2, 0.0 }
 0x1eb   : > { %v1049_v7 = vmax.f32 %v947_v5, 0.0  ;;  %v1657_v8 = vpop.f32.mrb[16].mxu1 }
 0x1ec   : > { %v962_v9 = vadd.f32 %v1657_v8, %v2112_v43  ;;  %v956_v10 = vpop.f32.mrb[17].mxu1  ;;  %v1845_v8 = vmov 1966171168  }
 0x1ed   : > { %v2145_v11 = vpack.c.bf16 %v1050_v6, %v1049_v7  ;;  %v957_v12 = vadd.f32 %v2112_v43, %v956_v10 }
 0x1ee   : > { %v1052_v14 = vmax.f32 %v962_v9, 0.0  ;;  %v1252_v9 = vunpack.c.l.s4 %v1845_v8 }
 0x1ef   : > { %v1051_v15 = vmax.f32 %v957_v12, 0.0  ;;  %v1660_v16 = vpop.f32.mrb[18].mxu1 }
 0x1f0   : > { %v972_v17 = vadd.f32 %v1660_v16, %v2112_v43  ;;  %v966_v18 = vpop.f32.mrb[19].mxu1  ;;  %v1253_v12 = vunpack.c.0.s8 %v1252_v9 }
 0x1f1   : > { %v1691_v20 = vpack.c.bf16 %v1052_v14, %v1051_v15  ;;  %v967_v21 = vadd.f32 %v2112_v43, %v966_v18 }
 0x1f2   : > { %v1054_v22 = vmax.f32 %v972_v17, 0.0 }
 0x1f3   : > { %v1053_v23 = vmax.f32 %v967_v21, 0.0  ;;  %1693 = vmatprep.subr.msk.bf16.mxu0 %vm2151_vm2, %v1691_v20  ;;  %v1663_v24 = vpop.f32.mrb[20].mxu1 }
 0x1f4   : > { %1696 = vmatpush3.bf16.xpose.msk.msra.mxu0 %vm2151_vm2, %v2117_v25  ;;  %v982_v26 = vadd.f32 %v1663_v24, %v2112_v43  ;;  %v976_v27 = vpop.f32.mrb[21].mxu1 }
 0x1f5   : > { %v1697_v28 = vpack.c.bf16 %v1054_v22, %v1053_v23  ;;  %v977_v29 = vadd.f32 %v2112_v43, %v976_v27 }
 0x1f6   : > { %v1056_v30 = vmax.f32 %v982_v26, 0.0 }
 0x1f7   : > { %1699 = vmatprep.subr.msk.bf16.mxu0 %vm2151_vm2, %v1697_v28  ;;  %v1055_v31 = vmax.f32 %v977_v29, 0.0  ;;  %v1666_v33 = vpop.f32.mrb[22].mxu1 }
 0x1f8   : > { %v992_v34 = vadd.f32 %v1666_v33, %v2112_v43  ;;  %v986_v35 = vpop.f32.mrb[23].mxu1 }
 0x1f9   : > { %v1703_v36 = vpack.c.bf16 %v1056_v30, %v1055_v31  ;;  %v987_v37 = vadd.f32 %v2112_v43, %v986_v35 }
 0x1fa   : > { %v1058_v38 = vmax.f32 %v992_v34, 0.0 }
 0x1fb   : > { %v1057_v25 = vmax.f32 %v987_v37, 0.0  ;;  %v1669_v40 = vpop.f32.mrb[24].mxu1 }
 0x1fc   : > { %1702 = vmatpush3.bf16.xpose.msk.msra.mxu0 %vm2151_vm2, %v2121_v32  ;;  %v1002_v41 = vadd.f32 %v1669_v40, %v2112_v43  ;;  %v996_v42 = vpop.f32.mrb[25].mxu1 }
 0x1fd   : > { %1705 = vmatprep.subr.msk.bf16.mxu0 %vm2151_vm2, %v1703_v36  ;;  %v1709_v44 = vpack.c.bf16 %v1058_v38, %v1057_v25  ;;  %v997_v45 = vadd.f32 %v2112_v43, %v996_v42 }
 0x1fe   : > { %v1060_v46 = vmax.f32 %v1002_v41, 0.0 }
 0x1ff   : > { %v1059_v48 = vmax.f32 %v997_v45, 0.0  ;;  %v1672_v49 = vpop.f32.mrb[26].mxu1 }
 0x200   : > { %v1012_v50 = vadd.f32 %v1672_v49, %v2112_v43  ;;  %v1006_v51 = vpop.f32.mrb[27].mxu1 }
 0x201   : > { %v1715_v52 = vpack.c.bf16 %v1060_v46, %v1059_v48  ;;  %v1007_v53 = vadd.f32 %v2112_v43, %v1006_v51 }
 0x202   : > { %v1062_v55 = vmax.f32 %v1012_v50, 0.0 }
 0x203   : > { %v1061_v32 = vmax.f32 %v1007_v53, 0.0  ;;  %v1675_v56 = vpop.f32.mrb[28].mxu1 }
 0x204   : > { %1708 = vmatpush3.bf16.xpose.msk.msra.mxu0 %vm2151_vm2, %v2125_v39  ;;  %v1022_v57 = vadd.f32 %v1675_v56, %v2112_v43  ;;  %v1016_v58 = vpop.f32.mrb[29].mxu1 }
 0x205   : > { %1711 = vmatprep.subr.msk.bf16.mxu0 %vm2151_vm2, %v1709_v44  ;;  %v1721_v59 = vpack.c.bf16 %v1062_v55, %v1061_v32  ;;  %v1017_v60 = vadd.f32 %v2112_v43, %v1016_v58 }
 0x206   : > { %v1064_v62 = vmax.f32 %v1022_v57, 0.0 }
 0x207   : > { %v1063_v63 = vmax.f32 %v1017_v60, 0.0  ;;  %v1678_v0 = vpop.f32.mrb[30].mxu1 }
 0x208   : > { %v1032_v1 = vadd.f32 %v1678_v0, %v2112_v43  ;;  %v1026_v2 = vpop.f32.mrb[31].mxu1 }
 0x209   : > { %v1727_v3 = vpack.c.bf16 %v1064_v62, %v1063_v63  ;;  %v1027_v5 = vadd.f32 %v2112_v43, %v1026_v2  ;;  %v1074_v43 = vlaneseq }
 0x20a   : > { %v1066_v39 = vmax.f32 %v1032_v1, 0.0 }
 0x20b   : > { %v1065_v6 = vmax.f32 %v1027_v5, 0.0  ;;  %vm1268_vm3 = vcmp.lt.s32.totalorder %v1074_v43, 256 }
 0x20c   : > { %1714 = vmatpush3.bf16.xpose.msk.msra.mxu0 %vm2151_vm2, %v2129_v47  ;;  %v1075_v47 = vshrl.u32 %v1074_v43, 7 }
 0x20d   : > { %1717 = vmatprep.subr.msk.bf16.mxu0 %vm2151_vm2, %v1715_v52  ;;  %v1733_v7 = vpack.c.bf16 %v1066_v39, %v1065_v6 }
 0x20e   : > { %v1256_v17 = vsub.s32 %v1253_v12, %v1075_v47 }
 0x214   : > { %1720 = vmatpush3.bf16.xpose.msk.msra.mxu0 %vm2151_vm2, %v2133_v54  ;;  %v1076_v54 = vsub.s32 0, %v1075_v47 }
 0x215   : > { %1723 = vmatprep.subr.msk.bf16.mxu0 %vm2151_vm2, %v1721_v59 }
 0x21c   : > { %1726 = vmatpush3.bf16.xpose.msk.msra.mxu0 %vm2151_vm2, %v2137_v61  ;;  %v1072_v61 = vpop.permute.xlu0 %1071 }
 0x21d   : > { %1729 = vmatprep.subr.msk.bf16.mxu0 %vm2151_vm2, %v1727_v3  ;;  %v1077_v10 = vrot.slane %v1072_v61, %v1076_v54 }
 0x224   : > { %1732 = vmatpush3.bf16.xpose.msk.msra.mxu0 %vm2151_vm2, %v2141_v4 }
 0x225   : > { %1735 = vmatprep.subr.msk.bf16.mxu0 %vm2151_vm2, %v1733_v7 }
 0x22c   : > { %1738 = vmatpush3.bf16.xpose.msk.msra.mxu0 %vm2151_vm2, %v2145_v11 }
 0x233   : > { %1568 = vmatmul.mubr.msk.f32.vlgmr.msra.gmra.mrb[32].mxu0 %vm713_vm1, %v2105_v13 }
 0x306   : > { %v1243_v4 = vpop.f32.mrb[32].mxu0 }
 0x307   : > { %v1244_v14 = vadd.f32 %v1243_v4, %v1077_v10  ;;  %v1245_v15 = vpop.f32.mrb[33].mxu0 }
 0x308   : > { %v1246_v16 = vadd.f32 %v1245_v15, %v1077_v10 }
 0x30a   : > { %v1250_v18 = vcombine.low %v1244_v14, %v1246_v16  ;;  %1278 = sbr.rel (!%p1928_p5) target bundleno = 812 (0x32c), region = 52 }
 0x30c   : > { %v1257_v11 = vrot.slane %v1250_v18, %v1256_v17 }
 0x30e   : > { %v1264_v19 = vrot.slane %v1257_v11, %v1256_v17 }
 0x310   : > { %1270 = vst.msk [vmem:[%s286_s10] sm:$0x3] %vm1268_vm3, %v1264_v19 }
 0x311   : > { %s2282_s16 = smov (!%p1281_p11, %s1280_s16), 2 }
 0x312   : > { %s2216_s17 = sshll.u32 %s2282_s16, 4 }
 0x313   : > { %s1285_s19 = ssub.s32 32, %s2216_s17 }
 0x314   : > { %1286 = vsyncadd %s2211_s14, %s1285_s19  ;;  %p1459_p12 = scmp.ne.s32.totalorder %s2216_s17, 0  ;;  %s2225_s12 = scalar_lea.hbm %s2272_s7, %s1945_s18 }
 0x315   : > { %s1291_s22 = sshll.u32 %s286_s10, 4  ;;  %s1846_s23 = smov [#allocation3]   ;;  %s1292_s22 = int_to_ptr.vmem [resolvable:$true] %s1291_s22 }
 0x316   : > { %s1780_s6 = scalar_lea.vmem %s1292_s22, %s2216_s17  ;;  %s1784_s24 = sshll.u32 %s1846_s23, 4  ;;  %s1785_s24 = int_to_ptr.vmem [resolvable:$false] %s1784_s24 }
 0x317   : > { %p1781_p13 = scmp.ne.s32.totalorder %s1292_s22, %s1780_s6  ;;  %s1786_s25 = scalar_lea.vmem %s1785_s24, 64 }
 0x318   : > { %p1787_p2 = scmp.lt.s32.totalorder %s1292_s22, %s1785_s24  ;;  %p1788_p3 = scmp.lt.s32.totalorder %s1786_s25, %s1780_s6 }
 0x319   : > { %p1782_p0 = pnand %p1781_p13, %p1459_p12 }
 0x31a   : > { %p1789_p4 = por %p1788_p3, %p1787_p2 }
 0x31b   : > { %p1783_p1 = pneg %p1782_p0 }
 0x31d   : > { %p1790_p5 = pnand %p1789_p4, %p1783_p1 }
 0x31f   : > { %1793 = shalt.err (!%p1790_p5)
}
 0x320   : > { %s1794_s18 = scalar_lea.hbm %s2225_s12, %s2216_s17  ;;  %s1798_s10 = scalar_lea.hbm %s2272_s7, 48 }
 0x321   : > { %p1795_p7 = scmp.ne.s32.totalorder %s2225_s12, %s1794_s18  ;;  %p1799_p10 = scmp.lt.u32.totalorder %s2225_s12, %s2272_s7 }
 0x322   : > { %p1800_p11 = scmp.lt.u32.totalorder %s1798_s10, %s1794_s18  ;;  %p1802_p0 = scmp.lt.u32.totalorder %s1794_s18, %s2225_s12 }
 0x323   : > { %p1796_p8 = pnand %p1795_p7, %p1459_p12 }
 0x324   : > { %p1801_p13 = por %p1800_p11, %p1799_p10 }
 0x325   : > { %p1797_p9 = pneg %p1796_p8 }
 0x326   : > { %p1803_p1 = por %p1802_p0, %p1801_p13 }
 0x328   : > { %p1804_p2 = pnand %p1803_p1, %p1797_p9 }
 0x32a   : > { %1807 = shalt.err (!%p1804_p2)
}
 0x32b   : > { %1294 = dma.vmem_to_hbm [thread:$0]  (%p1459_p12), %s1292_s22, %s2216_s17, %s2225_s12, %s2211_s14  }
 0x32c PF: > { %p1744_p3 = scmp.ge.s32.totalorder %s1842_s29, 2  ;;  %s1303_s19 = sand.u32 1, %s1830_s26  }
 0x32d   : > { %s1304_s20 = scalar_lea.sflag [#allocation4], %s1303_s19 }
 0x32e   : > { %p1741_p4 = pnand %p1744_p3, %p1932_p6 }
 0x330   : > { %1825 = dma.done.wait (!%p1741_p4), %s1304_s20, 32  }
 0x331   : > { %1827 = vsyncadd (!%p1741_p4), %s1304_s20, 4294967264  ;;  %p19_p5 = scmp.ge.s32.totalorder %s1915_s8, 4   ;;  %s2277_s26 = smov %s1834_s27 }
 0x332   : > { %s2278_s27 = smov %s1838_s28  ;;  %s2279_s28 = smov %s1926_s11 }
 0x333   : > { %s2280_s29 = smov %s1915_s8  ;;  %21 = sbr.rel (!%p19_p5) target bundleno = 6 (0x6), region = 83 }
 0x33a   :  { %1309 = vsyncpa [#allocation4], 1 }
 0x33b   :  { %1311 = vsyncpa [#allocation4 + $0x1], 1 }

</bundles_post_ra>
